<compile_context>
chip_gen: v7x
topology: tpu7x:2x2x1
jax: 0.10.0
libtpu: 0.0.40
codegen_flags: <defaults>
</compile_context>

<pallas_src>
import functools
import math

import numpy as np
import jax
import jax.numpy as jnp
from jax import lax
from jax.experimental import pallas as pl
from jax.experimental.pallas import tpu as pltpu

_LANE = 128


def _round_up(x, m):
    return ((x + m - 1) // m) * m


# ----------------------------------------------------------------------------
# Glue: gate-matrix construction (parameter setup, plain JAX / numpy)
# ----------------------------------------------------------------------------
_CNOT4 = np.array([[1, 0, 0, 0],
                   [0, 1, 0, 0],
                   [0, 0, 0, 1],
                   [0, 0, 1, 0]], dtype=np.float64)


def _cnot_chain(width, start):
    """Full-space matrix of CNot(start, width): CNOT(i, i+1) for i in range(start, width-1, 2)."""
    M = np.eye(2 ** width, dtype=np.float64)
    for i in range(start, width - 1, 2):
        G = np.kron(np.kron(np.eye(2 ** i), _CNOT4), np.eye(2 ** (width - i - 2)))
        M = G @ M  # gates queued earlier are applied earlier
    return M


def _kron_ry(angles):
    """kron_q RY(angles[q]), wire 0 = leftmost (most-significant) factor."""
    M = jnp.ones((1, 1), dtype=jnp.float32)
    for q in range(angles.shape[0]):
        c = jnp.cos(angles[q] / 2.0)
        s = jnp.sin(angles[q] / 2.0)
        ry = jnp.stack([jnp.stack([c, -s]), jnp.stack([s, c])])
        M = jnp.kron(M, ry)
    return M


def _build_total_T(params, amplitude_embedding):
    """Fold all Entangle layers into one (D, D) matrix (transposed full unitary).

    Batch-independent, O(depth * D^3) once outside the kernel, so the kernel
    only needs a single psi @ total_T matmul.
    """
    depth, width = params.shape
    if amplitude_embedding:
        w = jnp.float32(math.pi) * jnp.tanh(params)      # weights = pi * tanh(weights)
    else:
        w = 2.0 * jnp.arctan(2.0 * params)               # weights = 2 * arctan(2 * weights)
    cnots = jnp.asarray(_cnot_chain(width, 1) @ _cnot_chain(width, 0), dtype=jnp.float32)
    U = jnp.eye(2 ** width, dtype=jnp.float32)
    for d in range(depth):
        # per layer: CNot(0,...), CNot(1,...), then Rotation(w)  =>  L = R @ C1 @ C0
        L = jnp.dot(_kron_ry(w[d]), cnots, precision=lax.Precision.HIGHEST)
        U = jnp.dot(L, U, precision=lax.Precision.HIGHEST)   # later layers applied after earlier
    return U.T                                               # row-vector convention: psi <- psi @ U.T


def _zsign_table_padded(width, out):
    """zsigns[s, q] = <s| PauliZ(wire q) |s>, padded with zero columns to a lane-dense width."""
    D = 2 ** width
    out_pad = _round_up(max(out, 1), _LANE)
    s = np.arange(D)
    zs = np.zeros((D, out_pad), dtype=np.float32)
    for q in range(out):
        zs[:, q] = 1.0 - 2.0 * ((s >> (width - 1 - q)) & 1)
    return jnp.asarray(zs)


def _angle_embed(x):
    """Hadamard(width); Rotation(x*pi - pi/2) on |0...0>  ->  product-state amplitudes (B, 2**width)."""
    B, width = x.shape
    phi = x * np.pi - np.pi / 2.0
    c = jnp.cos(phi / 2.0)
    s = jnp.sin(phi / 2.0)
    u0 = (c - s) / np.sqrt(2.0)   # amplitude of |0> per qubit
    u1 = (c + s) / np.sqrt(2.0)   # amplitude of |1> per qubit
    psi = jnp.ones((B, 1), dtype=jnp.float32)
    for q in range(width):        # wire 0 = most-significant factor
        uq = jnp.stack([u0[:, q], u1[:, q]], axis=1)      # (B, 2)
        psi = (psi[:, :, None] * uq[:, None, :]).reshape(B, -1)
    return psi


# ----------------------------------------------------------------------------
# Pallas kernel: the per-sample circuit hot path
# ----------------------------------------------------------------------------
def _circuit_kernel(psi_ref, u_ref, z_ref, out_ref, *, normalize):
    psi = psi_ref[...]                                    # (TB, D) f32
    if normalize:                                         # AmplitudeEmbedding(normalize=True, pad_with=0.0)
        nrm = jnp.sum(psi * psi, axis=-1, keepdims=True)
        psi = psi * lax.rsqrt(jnp.maximum(nrm, jnp.float32(1e-12)))
    # all Entangle layers folded into a single matmul (default MXU precision)
    psi = jnp.dot(psi, u_ref[...], preferred_element_type=jnp.float32)
    probs = psi * psi                                     # Born probabilities (real state)
    # Measure(range(out)) = PauliZ expvals; z_ref is lane-dense (D, 128)
    out_ref[...] = jnp.dot(probs, z_ref[...],
                           preferred_element_type=jnp.float32).astype(out_ref.dtype)


def _circuit_pallas(psi0, total_T, zs_pad, *, normalize):
    B, D = psi0.shape
    out_pad = zs_pad.shape[1]
    TB = 256 if B >= 256 else _round_up(B, 8)             # batch tile (>= MXU rows when B is large)
    B_pad = _round_up(B, TB)
    if B_pad != B:
        psi0 = jnp.pad(psi0, ((0, B_pad - B), (0, 0)))
    kernel = functools.partial(_circuit_kernel, normalize=normalize)
    y = pl.pallas_call(
        kernel,
        out_shape=jax.ShapeDtypeStruct((B_pad, out_pad), jnp.float32),
        grid_spec=pltpu.PrefetchScalarGridSpec(
            num_scalar_prefetch=0,
            grid=(B_pad // TB,),
            in_specs=[
                pl.BlockSpec((TB, D), lambda i: (i, 0)),       # batch-tiled statevectors
                pl.BlockSpec((D, D), lambda i: (0, 0)),        # folded circuit unitary (resident)
                pl.BlockSpec((D, out_pad), lambda i: (0, 0)),  # lane-dense PauliZ sign table
            ],
            out_specs=pl.BlockSpec((TB, out_pad), lambda i: (i, 0)),
        ),
        compiler_params=pltpu.CompilerParams(dimension_semantics=("parallel",)),
    )(psi0, total_T, zs_pad)
    return y[:B]


# ----------------------------------------------------------------------------
# Circuit.forward equivalent
# ----------------------------------------------------------------------------
def circuit_forward(x, params, out, amplitude_embedding):
    """Equivalent of Circuit(width, depth, out, amplitude_embedding).forward(x).

    Accepts (F,) or (B, F); returns (out,) or (B, out) float32.
    """
    x = jnp.asarray(x, jnp.float32)
    single = x.ndim == 1
    if single:
        x = x[None, :]
    depth, width = params.shape
    D = 2 ** width
    total_T = _build_total_T(params, amplitude_embedding)
    zs_pad = _zsign_table_padded(width, out)
    if amplitude_embedding:
        B, F = x.shape
        assert F <= D, "amplitude embedding needs len(features) <= 2**width"
        psi0 = jnp.pad(x, ((0, 0), (0, D - F)))           # pad_with=0.0 (normalized in-kernel)
        y = _circuit_pallas(psi0, total_T, zs_pad, normalize=True)
    else:
        assert x.shape[1] == width, f"Expected input of len {width}"
        psi0 = _angle_embed(x)
        y = _circuit_pallas(psi0, total_T, zs_pad, normalize=False)
    y = y[:, :out]
    return y[0] if single else y


# ----------------------------------------------------------------------------
# SEQUENT.forward equivalent
# ----------------------------------------------------------------------------
def sequent_forward(x, comp_w, comp_b, sur_w, sur_b, circuit_params, out, mode="quantum"):
    """SEQUENT.forward(x) = classification(compression(x)).

    compression = Sigmoid(Linear(i, width)); classification = circuit (quantum/hybrid
    modes, amplitude_embedding=False) or surrogate Linear (classical mode).
    """
    x = jnp.asarray(x, jnp.float32)
    h = jax.nn.sigmoid(x @ comp_w.T + comp_b)             # torch Linear: x @ W.T + b
    if mode == "classical":
        # TODO(synk): surrogate head is a trivial (B,width)@(width,o) linear; left in XLA.
        return h @ sur_w.T + sur_b
    return circuit_forward(h, circuit_params, out, amplitude_embedding=False)


# ----------------------------------------------------------------------------
# Pure numpy float64 reference (independent of the Pallas path) for cross-check
# ----------------------------------------------------------------------------
def _reference_circuit(x, params, out, amplitude_embedding):
    x = np.asarray(x, np.float64)
    params = np.asarray(params, np.float64)
    if x.ndim == 1:
        x = x[None]
    depth, width = params.shape
    D = 2 ** width
    if amplitude_embedding:
        w = math.pi * np.tanh(params)
        psi = np.zeros((x.shape[0], D))
        psi[:, : x.shape[1]] = x
        psi = psi / np.maximum(np.linalg.norm(psi, axis=1, keepdims=True), 1e-12)
    else:
        w = 2.0 * np.arctan(2.0 * params)
        phi = x * np.pi - np.pi / 2.0
        c, s = np.cos(phi / 2.0), np.sin(phi / 2.0)
        u0 = (c - s) / np.sqrt(2.0)
        u1 = (c + s) / np.sqrt(2.0)
        psi = np.ones((x.shape[0], 1))
        for q in range(width):
            uq = np.stack([u0[:, q], u1[:, q]], axis=1)
            psi = (psi[:, :, None] * uq[:, None, :]).reshape(x.shape[0], -1)
    cnots = _cnot_chain(width, 1) @ _cnot_chain(width, 0)
    for d in range(depth):
        M = np.ones((1, 1))
        for q in range(width):
            cq, sq = np.cos(w[d, q] / 2.0), np.sin(w[d, q] / 2.0)
            M = np.kron(M, np.array([[cq, -sq], [sq, cq]]))
        L = M @ cnots
        psi = psi @ L.T
    sidx = np.arange(D)
    zs = np.zeros((D, out))
    for q in range(out):
        zs[:, q] = 1.0 - 2.0 * ((sidx >> (width - 1 - q)) & 1)
    return (psi * psi) @ zs


if __name__ == "__main__":
    key = jax.random.PRNGKey(0)
    k1, k2, k3, k4, k5, k6 = jax.random.split(key, 6)
    B = 8

    # BankNote: input_dimension=4, num_classes=2; pick width=4 qubits (D=16), depth=3.
    in_dim, n_classes, width, depth = 4, 2, 4, 3
    comp_w = 0.5 * jax.random.normal(k1, (width, in_dim), jnp.float32)
    comp_b = 0.1 * jax.random.normal(k2, (width,), jnp.float32)
    sur_w = 0.5 * jax.random.normal(k3, (n_classes, width), jnp.float32)
    sur_b = jnp.zeros((n_classes,), jnp.float32)
    circ_params = jax.random.normal(k4, (depth, width), jnp.float32)   # torch.randn(depth, width)
    x = jax.random.uniform(k5, (B, in_dim), jnp.float32)               # MinMax-scaled-like features in [0, 1]

    # SEQUENT forward, quantum/hybrid mode: circuit(compression(x))  [Pallas kernel path]
    y_q = jax.block_until_ready(
        sequent_forward(x, comp_w, comp_b, sur_w, sur_b, circ_params, n_classes, mode="quantum"))
    h_np = np.asarray(jax.nn.sigmoid(x @ comp_w.T + comp_b))
    ref_q = _reference_circuit(h_np, np.asarray(circ_params), n_classes, amplitude_embedding=False)
    np.testing.assert_allclose(np.asarray(y_q), ref_q, rtol=2e-2, atol=2e-2)
    assert y_q.shape == (B, n_classes) and y_q.dtype == jnp.float32

    # SEQUENT forward, classical mode: surrogate(compression(x))  [plain JAX]
    y_c = jax.block_until_ready(
        sequent_forward(x, comp_w, comp_b, sur_w, sur_b, circ_params, n_classes, mode="classical"))
    assert y_c.shape == (B, n_classes)

    # Amplitude-embedding Circuit path (the Circuit module supports both embeddings).
    width_a, depth_a, out_a, feat_a = 3, 4, 2, 6
    params_a = jax.random.normal(k6, (depth_a, width_a), jnp.float32)
    x_a = jax.random.uniform(k2, (B, feat_a), jnp.float32)
    y_a = jax.block_until_ready(circuit_forward(x_a, params_a, out_a, amplitude_embedding=True))
    ref_a = _reference_circuit(np.asarray(x_a), np.asarray(params_a), out_a, True)
    np.testing.assert_allclose(np.asarray(y_a), ref_a, rtol=2e-2, atol=2e-2)
    assert y_a.shape == (B, out_a) and y_a.dtype == jnp.float32

    print("KERNEL_OK")
</pallas_src>

<mosaic_0001>
module attributes {stable_mosaic.version = 11 : i64} {
  func.func @_circuit_kernel(%arg0: i32, %arg1: memref<8x16xf32, #tpu.memory_space<vmem>>, %arg2: memref<16x16xf32, #tpu.memory_space<vmem>>, %arg3: memref<16x128xf32, #tpu.memory_space<vmem>>, %arg4: memref<8x128xf32, #tpu.memory_space<vmem>>) attributes {dimension_semantics = [#tpu.dimension_semantics<parallel>], iteration_bounds = array<i64: 1>, scalar_prefetch = 0 : i64, scratch_operands = 0 : i64, tpu.core_type = #tpu.core_type<tc>, window_params = [{transform_indices = @transform_0, window_bounds = array<i64: 8, 16>}, {pipeline_mode = #tpu.pipeline_mode<synchronous>, transform_indices = @transform_1, window_bounds = array<i64: 16, 16>}, {pipeline_mode = #tpu.pipeline_mode<synchronous>, transform_indices = @transform_2, window_bounds = array<i64: 16, 128>}, {transform_indices = @transform_3, window_bounds = array<i64: 8, 128>}]} {
    %c0 = arith.constant 0 : index
    %c0_0 = arith.constant 0 : index
    %0 = vector.load %arg1[%c0, %c0_0] : memref<8x16xf32, #tpu.memory_space<vmem>>, vector<8x16xf32>
    %c0_1 = arith.constant 0 : index
    %c0_2 = arith.constant 0 : index
    %1 = vector.load %arg2[%c0_1, %c0_2] : memref<16x16xf32, #tpu.memory_space<vmem>>, vector<16x16xf32>
    %cst = arith.constant dense<0.000000e+00> : vector<8x16xf32>
    %2 = tpu.matmul %0, %1, %cst {dimension_numbers = #tpu.dot_dimension_numbers<[1], [0], [0], [1], [0, 0, 1, 1], [], []>} : vector<8x16xf32>, vector<16x16xf32>, vector<8x16xf32> -> vector<8x16xf32>
    %3 = arith.mulf %2, %2 : vector<8x16xf32>
    %c0_3 = arith.constant 0 : index
    %c0_4 = arith.constant 0 : index
    %4 = vector.load %arg3[%c0_3, %c0_4] : memref<16x128xf32, #tpu.memory_space<vmem>>, vector<16x128xf32>
    %cst_5 = arith.constant dense<0.000000e+00> : vector<8x128xf32>
    %5 = tpu.matmul %3, %4, %cst_5 {dimension_numbers = #tpu.dot_dimension_numbers<[1], [0], [0], [1], [0, 0, 1, 1], [], []>} : vector<8x16xf32>, vector<16x128xf32>, vector<8x128xf32> -> vector<8x128xf32>
    %c0_6 = arith.constant 0 : index
    %c0_7 = arith.constant 0 : index
    %6 = vector.load %arg4[%c0_6, %c0_7] : memref<8x128xf32, #tpu.memory_space<vmem>>, vector<8x128xf32>
    tpu.vector_store %arg4[%c0_6, %c0_7], %5 {strides = array<i32>} : memref<8x128xf32, #tpu.memory_space<vmem>>, vector<8x128xf32>,
    return
  }
  func.func @transform_0(%arg0: i32) -> (i32, i32) {
    %c0_i32 = arith.constant 0 : i32
    %c0_i32_0 = arith.constant 0 : i32
    return %arg0, %c0_i32 : i32, i32
  }
  func.func @transform_1(%arg0: i32) -> (i32, i32) {
    %c0_i32 = arith.constant 0 : i32
    %c0_i32_0 = arith.constant 0 : i32
    %c0_i32_1 = arith.constant 0 : i32
    return %c0_i32, %c0_i32_0 : i32, i32
  }
  func.func @transform_2(%arg0: i32) -> (i32, i32) {
    %c0_i32 = arith.constant 0 : i32
    %c0_i32_0 = arith.constant 0 : i32
    %c0_i32_1 = arith.constant 0 : i32
    return %c0_i32, %c0_i32_0 : i32, i32
  }
  func.func @transform_3(%arg0: i32) -> (i32, i32) {
    %c0_i32 = arith.constant 0 : i32
    %c0_i32_0 = arith.constant 0 : i32
    return %arg0, %c0_i32 : i32, i32
  }
}

</mosaic_0001>

<bundles_post_ra>
// kernel: tpu_custom_call.1
= control target key start
LH: loop header
LB: loop body
LE: loop exit
PB: predicated region body
PF: predicated region fallthrough
CT: control target
= control target key end

     0   :  { %8 = vsyncpa [#allocation3], 0  ;;  %s438_s0 = inlined_call_operand.hbm [shape: f32[8,16], index: 0, kind: input, shape index: {}]   ;;  %s439_s1 = inlined_call_operand.hbm [shape: f32[16,16], index: 1, kind: input, shape index: {}]   ;;  %s440_s2 = inlined_call_operand.hbm [shape: f32[16,128], index: 2, kind: input, shape index: {}]   ;;  %s441_s3 = inlined_call_operand.hbm [shape: f32[8,128], index: 3, kind: output, shape index: {}]  }
   0x1   :  { %9 = vsyncpa [#allocation6], 0 }
   0x2   :  { %10 = vsyncpa [#allocation4], 0  ;;  %s355_s12 = smov [#allocation5]   ;;  %s261_s16 = scalar_lea.hbm %s439_s1, 256 }
   0x3   :  { %s26_s13 = sshll.u32 %s355_s12, 4  ;;  %p262_p0 = scmp.ne.s32.totalorder %s439_s1, %s261_s16  ;;  %s27_s13 = int_to_ptr.vmem [resolvable:$true] %s26_s13 }
   0x4   :  { %p265_p1 = scmp.lt.u32.totalorder %s261_s16, %s439_s1 }
   0x6   :  { %p267_p2 = pnand %p265_p1, %p262_p0 }
   0x8   :  { %270 = shalt.err (!%p267_p2)
}
   0x9   :  { %s271_s21 = scalar_lea.vmem %s27_s13, 256  ;;  %p276_p4 = scmp.lt.s32.totalorder %s27_s13, %s27_s13 }
   0xa   :  { %p272_p3 = scmp.ne.s32.totalorder %s27_s13, %s271_s21  ;;  %p277_p5 = scmp.lt.s32.totalorder %s271_s21, %s271_s21 }
   0xc   :  { %p278_p6 = por %p277_p5, %p276_p4 }
   0xe   :  { %p279_p7 = pnand %p278_p6, %p272_p3 }
  0x10   :  { %282 = shalt.err (!%p279_p7)
}
  0x11   :  { %s356_s22 = smov 128   ;;  %s357_s23 = smov 8  }
  0x12   :  { %32 = dma.hbm_to_vmem [thread:$0]  %s439_s1, 256, %s27_s13, [#allocation6], %s356_s22, %s356_s22, %s357_s23  }
  0x13   :  { %s358_s26 = smov [#allocation2]   ;;  %s359_s28 = smov [#allocation7]  }
  0x14   :  { %s17_s27 = sshll.u32 %s358_s26, 4  ;;  %s38_s29 = sshll.u32 %s359_s28, 4  ;;  %s18_s27 = int_to_ptr.vmem [resolvable:$true] %s17_s27  ;;  %s39_s29 = int_to_ptr.vmem [resolvable:$true] %s38_s29 }
  0x15   :  { %s283_s5 = scalar_lea.hbm %s438_s0, 128 }
  0x16   :  { %p284_p8 = scmp.ne.s32.totalorder %s438_s0, %s283_s5  ;;  %p287_p9 = scmp.lt.u32.totalorder %s283_s5, %s438_s0 }
  0x18   :  { %p289_p10 = pnand %p287_p9, %p284_p8 }
  0x1a   :  { %292 = shalt.err (!%p289_p10)
}
  0x1b   :  { %s293_s1 = scalar_lea.vmem %s18_s27, 128  ;;  %p298_p12 = scmp.lt.s32.totalorder %s18_s27, %s18_s27 }
  0x1c   :  { %p294_p11 = scmp.ne.s32.totalorder %s18_s27, %s293_s1  ;;  %p299_p13 = scmp.lt.s32.totalorder %s293_s1, %s293_s1 }
  0x1e   :  { %p300_p0 = por %p299_p13, %p298_p12 }
  0x20   :  { %p301_p1 = pnand %p300_p0, %p294_p11 }
  0x22   :  { %304 = shalt.err (!%p301_p1)
}
  0x23   :  { %20 = dma.hbm_to_vmem [thread:$0]  %s438_s0, 128, %s18_s27, [#allocation3]  }
  0x24   :  { %s305_s14 = scalar_lea.hbm %s440_s2, 256 }
  0x25   :  { %p306_p2 = scmp.ne.s32.totalorder %s440_s2, %s305_s14  ;;  %p309_p3 = scmp.lt.u32.totalorder %s305_s14, %s440_s2 }
  0x27   :  { %p311_p4 = pnand %p309_p3, %p306_p2 }
  0x29   :  { %314 = shalt.err (!%p311_p4)
}
  0x2a   :  { %s315_s19 = scalar_lea.vmem %s39_s29, 256  ;;  %p320_p6 = scmp.lt.s32.totalorder %s39_s29, %s39_s29 }
  0x2b   :  { %p316_p5 = scmp.ne.s32.totalorder %s39_s29, %s315_s19  ;;  %p321_p7 = scmp.lt.s32.totalorder %s315_s19, %s315_s19 }
  0x2d   :  { %p322_p8 = por %p321_p7, %p320_p6 }
  0x2f   :  { %p323_p9 = pnand %p322_p8, %p316_p5 }
  0x31   :  { %326 = shalt.err (!%p323_p9)
}
  0x32   :  { %44 = dma.hbm_to_vmem [thread:$0]  %s440_s2, 256, %s39_s29, [#allocation6], %s356_s22, %s356_s22, %s357_s23  }
  0x33   :  { %349 = dma.done.wait [#allocation3], 128  }
  0x34   :  { %350 = vsyncadd [#allocation3], 4294967168 }
  0x35   :  { %351 = dma.done.wait [#allocation6], 512  }
  0x36   :  { %352 = vsyncadd [#allocation6], 4294966784  ;;  %v360_v0 = vmov 0.0|0.0   ;;  %vm361_vm0 = vmmov 0   ;;  %v362_v1 = vmov 0.0   ;;  %v55_v2 = vld [vmem:[#allocation5] sm:$0xff] }
  0x37   :  { %246 = vmatprep.subr.bf16.mxu0 %v360_v0  ;;  %236 = vmatprep.mubr.msk.f32.mxu0 %vm361_vm0, %v362_v1  ;;  %v56_v3 = vld [vmem:[#allocation5 + $0x8] sm:$0xff]  ;;  %v54_v5 = vld [vmem:[#allocation2] sm:$0xff]  ;;  %vm57_vm1 = vcmask 130048   ;;  %v132_v6 = vld [vmem:[#allocation7] sm:$0xff]  ;;  %s363_s2 = smov [#allocation8]  }
  0x38   :  { %249 = vmatprep.subr.bf16.mxu1 %v360_v0  ;;  %243 = vmatprep.mubr.msk.f32.mxu1 %vm361_vm0, %v362_v1  ;;  %v247_v4 = vpack.c.bf16 %v56_v3, %v55_v2  ;;  %v133_v7 = vld [vmem:[#allocation7 + $0x8] sm:$0xff]  ;;  %s214_s21 = sshll.u32 %s363_s2, 4  ;;  %s215_s21 = int_to_ptr.vmem [resolvable:$true] %s214_s21 }
  0x39   :  { %v250_v8 = vpack.c.bf16 %v133_v7, %v132_v6  ;;  %s327_s22 = scalar_lea.vmem %s215_s21, 128  ;;  %p332_p11 = scmp.lt.s32.totalorder %s215_s21, %s215_s21 }
  0x3a   :  { %248 = vmatpush3.bf16.msra.mxu0 %v247_v4  ;;  %p328_p10 = scmp.ne.s32.totalorder %s215_s21, %s327_s22  ;;  %p333_p12 = scmp.lt.s32.totalorder %s327_s22, %s327_s22 }
  0x3b   :  { %251 = vmatpush3.bf16.msra.mxu1 %v250_v8 }
  0x3c   :  { %p334_p13 = por %p333_p12, %p332_p11 }
  0x3d   :  { %237 = vmatmul.mubr.msk.f32.vlgmr.msra.gmra.mrb[0].mxu0 %vm57_vm1, %v54_v5 }
  0x3e   :  { %p335_p0 = pnand %p334_p13, %p328_p10 }
 0x110   :  { %v127_v9 = vpop.f32.mrb[0].mxu0 }
 0x111   :  { %v131_v10 = vmul.f32 %v127_v9, %v127_v9  ;;  %v238_v11 = vpop.f32.mrb[1].mxu0 }
 0x113   :  { %244 = vmatmul.mubr.msk.f32.vlgmr.msra.gmra.mrb[0].mxu1 %vm57_vm1, %v131_v10 }
 0x1e6   :  { %v203_v12 = vpop.f32.mrb[0].mxu1 }
 0x1e7   :  { %207 = vst [vmem:[#allocation8] sm:$0xff] %v203_v12  ;;  %v245_v13 = vpop.f32.mrb[1].mxu1 }
 0x1e8   :  { %338 = shalt.err (!%p335_p0)
}
 0x1e9   :  { %s339_s25 = scalar_lea.hbm %s441_s3, 128 }
 0x1ea   :  { %p340_p1 = scmp.ne.s32.totalorder %s441_s3, %s339_s25  ;;  %p343_p2 = scmp.lt.u32.totalorder %s339_s25, %s441_s3 }
 0x1ec   :  { %p345_p3 = pnand %p343_p2, %p340_p1 }
 0x1ee   :  { %348 = shalt.err (!%p345_p3)
}
 0x1ef   :  { %217 = dma.vmem_to_hbm [thread:$0]  %s215_s21, 128, %s441_s3, [#allocation4]  }
 0x1f0   :  { %353 = dma.done.wait [#allocation4], 128  }
 0x1f1   :  { %354 = vsyncadd [#allocation4], 4294967168 }
 0x1f2   :  { %221 = vsyncpa [#allocation3], 1 }
 0x1f3   :  { %222 = vsyncpa [#allocation6], 1 }
 0x1f4   :  { %223 = vsyncpa [#allocation4], 1 }

</bundles_post_ra>
